<compile_context>
chip_gen: v7x
topology: tpu7x:2x2x1
jax: 0.10.0
libtpu: 0.0.40
codegen_flags: <defaults>
</compile_context>

<pallas_src>
import functools

import jax
import jax.numpy as jnp
from jax.experimental import pallas as pl
from jax.experimental.pallas import tpu as pltpu

_KPAD = 4  # input features padded 3 -> 4 (even bf16 sublane packing for the MXU K dim)


def _make_kernel(elem_dtype):
    """elem_dtype: dtype for bias-add / ReLU (bf16 on v6e/v7x, f32 on v5e)."""

    def kernel(x_ref,
               w0_ref, b0_ref, w1_ref, b1_ref, w2_ref, b2_ref,
               w3_ref, b3_ref, w4_ref, b4_ref, w5_ref, b5_ref,
               out_ref):
        def dense_act(h, w_ref, b_ref):
            # [Fout, Fin] @ [Fin, Bt] -> [Fout, Bt]; bf16 MXU operands, f32 acc.
            z = jnp.dot(w_ref[...], h.astype(jnp.bfloat16),
                        preferred_element_type=jnp.float32)
            z = z.astype(elem_dtype) + b_ref[...]
            return jnp.maximum(z, 0.0)

        h = x_ref[...]                       # [4, Bt] bf16 (row 3 is zero padding)
        h = dense_act(h, w0_ref, b0_ref)     # Linear(3 -> 32)  + ReLU
        h = dense_act(h, w1_ref, b1_ref)     # Linear(32 -> 32) + ReLU
        h = dense_act(h, w2_ref, b2_ref)     # Conv1d #1 (as dense) + ReLU
        h = dense_act(h, w3_ref, b3_ref)     # Conv1d #2 (as dense) + ReLU
        h = dense_act(h, w4_ref, b4_ref)     # Conv1d #3 (as dense) + ReLU
        # Linear(32 -> 1): VPU multiply + sublane (XLU) reduce, f32 for accuracy.
        z = jnp.sum(h.astype(jnp.float32) * w5_ref[...], axis=0, keepdims=True)
        z = z + b5_ref[...]
        out_ref[...] = jax.nn.sigmoid(z).astype(out_ref.dtype)

    return kernel


def _round_up(n, m):
    return -(-n // m) * m


@functools.partial(jax.jit, static_argnames=("b_tile",))
def custom_model_forward(x, kparams, *, b_tile=None):
    """x: [B, 3] float32.  kparams: kernel-layout params from prepare_params()."""
    B = x.shape[0]

    kind = jax.devices()[0].device_kind.lower()
    is_v7 = "v7" in kind
    # bf16 elementwise only where the VPU is bf16-native (v6e / v7x); f32 on v5e.
    elem_dtype = jnp.bfloat16 if ("v6" in kind or "v7" in kind) else jnp.float32

    needed = _round_up(B, 128)
    if b_tile is None:
        cap = 8192 if is_v7 else 32768          # v7x: 64 MiB VMEM -> smaller cap
    else:
        cap = max(128, (b_tile // 128) * 128)
    if is_v7 and needed >= 256:
        # >=2 grid steps so ("parallel",) shards batch tiles over v7x's 2 TCs.
        cap = min(cap, _round_up(needed // 2, 128))
    b_tile = max(128, min(cap, needed))
    B_pad = _round_up(B, b_tile)

    # Batch-on-lanes bf16 staging slab (single fused pad + transpose + cast).
    x_t = jnp.zeros((_KPAD, B_pad), jnp.bfloat16).at[:3, :B].set(
        x.astype(jnp.bfloat16).T)

    cast_b = lambda b: b.astype(elem_dtype)
    weights = (
        kparams["w0"], cast_b(kparams["b0"]),
        kparams["w1"], cast_b(kparams["b1"]),
        kparams["w2"], cast_b(kparams["b2"]),
        kparams["w3"], cast_b(kparams["b3"]),
        kparams["w4"], cast_b(kparams["b4"]),
        kparams["w5"], kparams["b5"],        # final layer stays f32 (VPU/XLU path)
    )

    grid = (B_pad // b_tile,)
    const_spec = lambda a: pl.BlockSpec(a.shape, lambda i: (0, 0))

    flops = int(B_pad) * (2 * _KPAD * 32 + 4 * (2 * 32 * 32) + 2 * 32)
    bytes_accessed = int(x_t.size * x_t.dtype.itemsize + B_pad * 4
                         + sum(int(w.size) * w.dtype.itemsize for w in weights))
    cost = pl.CostEstimate(flops=flops, transcendentals=int(B_pad),
                           bytes_accessed=bytes_accessed)

    vmem_limit = (48 << 20) if is_v7 else (96 << 20)

    out_t = pl.pallas_call(
        _make_kernel(elem_dtype),
        out_shape=jax.ShapeDtypeStruct((1, B_pad), jnp.float32),
        grid=grid,
        in_specs=[pl.BlockSpec((_KPAD, b_tile), lambda i: (0, i))]
                 + [const_spec(w) for w in weights],
        out_specs=pl.BlockSpec((1, b_tile), lambda i: (0, i)),
        compiler_params=pltpu.CompilerParams(
            dimension_semantics=("parallel",),
            vmem_limit_bytes=vmem_limit),
        cost_estimate=cost,
    )(x_t, *weights)

    return out_t[:, :B].T                    # back to [B, 1] (plain-JAX glue)


def init_params_pt(key):
    """PyTorch-layout parameters (Linear: [out,in], Conv1d: [out,in_ch,k], bias: [out])."""
    ks = jax.random.split(key, 12)

    def unif(k, shape, fan_in):
        bound = 1.0 / jnp.sqrt(jnp.float32(fan_in))
        return jax.random.uniform(k, shape, jnp.float32, -bound, bound)

    return {
        "lin0_w": unif(ks[0], (32, 3), 3),    "lin0_b": unif(ks[1], (32,), 3),
        "lin1_w": unif(ks[2], (32, 32), 32),  "lin1_b": unif(ks[3], (32,), 32),
        "conv0_w": unif(ks[4], (32, 16, 2), 32), "conv0_b": unif(ks[5], (32,), 32),
        "conv1_w": unif(ks[6], (32, 16, 2), 32), "conv1_b": unif(ks[7], (32,), 32),
        "conv2_w": unif(ks[8], (32, 16, 2), 32), "conv2_b": unif(ks[9], (32,), 32),
        "lin5_w": unif(ks[10], (1, 32), 32),  "lin5_b": unif(ks[11], (1,), 32),
    }


def prepare_params(p):
    """PyTorch-layout params -> kernel layout: [Fout, Fin] bf16 weights (w0 zero-padded
    from Fin=3 to Fin=4), [Fout, 1] f32 biases; conv weights flattened to dense."""
    bf16, f32 = jnp.bfloat16, jnp.float32
    w0 = jnp.zeros((32, _KPAD), bf16).at[:, :3].set(p["lin0_w"].astype(bf16))
    return {
        "w0": w0,                            "b0": p["lin0_b"].reshape(32, 1).astype(f32),
        "w1": p["lin1_w"].astype(bf16),      "b1": p["lin1_b"].reshape(32, 1).astype(f32),
        # Conv1d(16,32,k=2) over a length-2 input == dense over flat (ic*2+pos) feats.
        "w2": p["conv0_w"].reshape(32, 32).astype(bf16), "b2": p["conv0_b"].reshape(32, 1).astype(f32),
        "w3": p["conv1_w"].reshape(32, 32).astype(bf16), "b3": p["conv1_b"].reshape(32, 1).astype(f32),
        "w4": p["conv2_w"].reshape(32, 32).astype(bf16), "b4": p["conv2_b"].reshape(32, 1).astype(f32),
        "w5": p["lin5_w"].T.astype(f32),     "b5": p["lin5_b"].reshape(1, 1).astype(f32),
    }


def reference_forward(x, p):
    """Plain-JAX f32 reference that mirrors the PyTorch forward exactly."""
    h = jnp.maximum(x @ p["lin0_w"].T + p["lin0_b"], 0.0)
    h = jnp.maximum(h @ p["lin1_w"].T + p["lin1_b"], 0.0)
    for name in ("conv0", "conv1", "conv2"):
        hv = h.reshape(-1, 16, 2)                          # x.view(-1, 16, 2)
        h = jnp.einsum("oik,bik->bo", p[name + "_w"], hv) + p[name + "_b"]
        h = jnp.maximum(h, 0.0)
    z = h @ p["lin5_w"].T + p["lin5_b"]
    return jax.nn.sigmoid(z)


if __name__ == "__main__":
    key = jax.random.PRNGKey(0)
    k_param, k_x = jax.random.split(key)
    pt_params = init_params_pt(k_param)
    kparams = prepare_params(pt_params)

    # Small smoke test (single grid step, padded to one 128-lane tile).
    B = 8
    x = jax.random.normal(k_x, (B, 3), jnp.float32)
    out = jax.block_until_ready(custom_model_forward(x, kparams))
    ref = reference_forward(x, pt_params)
    assert out.shape == (B, 1), out.shape
    # bf16 MXU operands (+ bf16 elementwise on v6e/v7x) -> relaxed tolerance vs f32.
    assert jnp.allclose(out, ref, atol=3e-2, rtol=3e-2), (out, ref)

    # Exercise the multi-step grid + ragged-batch padding path.
    B2 = 300
    x2 = jax.random.normal(jax.random.PRNGKey(1), (B2, 3), jnp.float32)
    out2 = jax.block_until_ready(custom_model_forward(x2, kparams, b_tile=128))
    ref2 = reference_forward(x2, pt_params)
    assert out2.shape == (B2, 1), out2.shape
    assert jnp.allclose(out2, ref2, atol=3e-2, rtol=3e-2)

    print("KERNEL_OK")
</pallas_src>

<mosaic_0001>
module attributes {stable_mosaic.version = 11 : i64} {
  func.func @kernel(%arg0: i32, %arg1: memref<4x128xbf16, #tpu.memory_space<vmem>>, %arg2: memref<32x4xbf16, #tpu.memory_space<vmem>>, %arg3: memref<32x1xf32, #tpu.memory_space<vmem>>, %arg4: memref<32x32xbf16, #tpu.memory_space<vmem>>, %arg5: memref<32x1xf32, #tpu.memory_space<vmem>>, %arg6: memref<32x32xbf16, #tpu.memory_space<vmem>>, %arg7: memref<32x1xf32, #tpu.memory_space<vmem>>, %arg8: memref<32x32xbf16, #tpu.memory_space<vmem>>, %arg9: memref<32x1xf32, #tpu.memory_space<vmem>>, %arg10: memref<32x32xbf16, #tpu.memory_space<vmem>>, %arg11: memref<32x1xf32, #tpu.memory_space<vmem>>, %arg12: memref<32x1xf32, #tpu.memory_space<vmem>>, %arg13: memref<1x1xf32, #tpu.memory_space<vmem>>, %arg14: memref<1x128xf32, #tpu.memory_space<vmem>>) attributes {dimension_semantics = [#tpu.dimension_semantics<parallel>], iteration_bounds = array<i64: 1>, scalar_prefetch = 0 : i64, scratch_operands = 0 : i64, tpu.core_type = #tpu.core_type<tc>, window_params = [{transform_indices = @transform_0, window_bounds = array<i64: 4, 128>}, {pipeline_mode = #tpu.pipeline_mode<synchronous>, transform_indices = @transform_1, window_bounds = array<i64: 32, 4>}, {pipeline_mode = #tpu.pipeline_mode<synchronous>, transform_indices = @transform_2, window_bounds = array<i64: 32, 1>}, {pipeline_mode = #tpu.pipeline_mode<synchronous>, transform_indices = @transform_3, window_bounds = array<i64: 32, 32>}, {pipeline_mode = #tpu.pipeline_mode<synchronous>, transform_indices = @transform_4, window_bounds = array<i64: 32, 1>}, {pipeline_mode = #tpu.pipeline_mode<synchronous>, transform_indices = @transform_5, window_bounds = array<i64: 32, 32>}, {pipeline_mode = #tpu.pipeline_mode<synchronous>, transform_indices = @transform_6, window_bounds = array<i64: 32, 1>}, {pipeline_mode = #tpu.pipeline_mode<synchronous>, transform_indices = @transform_7, window_bounds = array<i64: 32, 32>}, {pipeline_mode = #tpu.pipeline_mode<synchronous>, transform_indices = @transform_8, window_bounds = array<i64: 32, 1>}, {pipeline_mode = #tpu.pipeline_mode<synchronous>, transform_indices = @transform_9, window_bounds = array<i64: 32, 32>}, {pipeline_mode = #tpu.pipeline_mode<synchronous>, transform_indices = @transform_10, window_bounds = array<i64: 32, 1>}, {pipeline_mode = #tpu.pipeline_mode<synchronous>, transform_indices = @transform_11, window_bounds = array<i64: 32, 1>}, {pipeline_mode = #tpu.pipeline_mode<synchronous>, transform_indices = @transform_12, window_bounds = array<i64: 1, 1>}, {transform_indices = @transform_13, window_bounds = array<i64: 1, 128>}]} {
    %c0 = arith.constant 0 : index
    %c0_0 = arith.constant 0 : index
    %0 = vector.load %arg1[%c0, %c0_0] : memref<4x128xbf16, #tpu.memory_space<vmem>>, vector<4x128xbf16>
    %c0_1 = arith.constant 0 : index
    %c0_2 = arith.constant 0 : index
    %1 = vector.load %arg2[%c0_1, %c0_2] : memref<32x4xbf16, #tpu.memory_space<vmem>>, vector<32x4xbf16>
    %cst = arith.constant dense<0.000000e+00> : vector<32x128xf32>
    %2 = tpu.matmul %1, %0, %cst {dimension_numbers = #tpu.dot_dimension_numbers<[1], [0], [0], [1], [0, 0, 1, 1], [], []>} : vector<32x4xbf16>, vector<4x128xbf16>, vector<32x128xf32> -> vector<32x128xf32>
    %c0_3 = arith.constant 0 : index
    %c0_4 = arith.constant 0 : index
    %3 = vector.load %arg3[%c0_3, %c0_4] : memref<32x1xf32, #tpu.memory_space<vmem>>, vector<32x1xf32>
    %4 = vector.broadcast %3 : vector<32x1xf32> to vector<32x128xf32>
    %5 = arith.addf %2, %4 : vector<32x128xf32>
    %cst_5 = arith.constant 0.000000e+00 : f32
    %6 = vector.broadcast %cst_5 : f32 to vector<32x128xf32>
    %7 = arith.maximumf %5, %6 : vector<32x128xf32>
    %c0_6 = arith.constant 0 : index
    %c0_7 = arith.constant 0 : index
    %8 = vector.load %arg4[%c0_6, %c0_7] : memref<32x32xbf16, #tpu.memory_space<vmem>>, vector<32x32xbf16>
    %9 = arith.truncf %7 : vector<32x128xf32> to vector<32x128xbf16>
    %cst_8 = arith.constant dense<0.000000e+00> : vector<32x128xf32>
    %10 = tpu.matmul %8, %9, %cst_8 {dimension_numbers = #tpu.dot_dimension_numbers<[1], [0], [0], [1], [0, 0, 1, 1], [], []>} : vector<32x32xbf16>, vector<32x128xbf16>, vector<32x128xf32> -> vector<32x128xf32>
    %c0_9 = arith.constant 0 : index
    %c0_10 = arith.constant 0 : index
    %11 = vector.load %arg5[%c0_9, %c0_10] : memref<32x1xf32, #tpu.memory_space<vmem>>, vector<32x1xf32>
    %12 = vector.broadcast %11 : vector<32x1xf32> to vector<32x128xf32>
    %13 = arith.addf %10, %12 : vector<32x128xf32>
    %cst_11 = arith.constant 0.000000e+00 : f32
    %14 = vector.broadcast %cst_11 : f32 to vector<32x128xf32>
    %15 = arith.maximumf %13, %14 : vector<32x128xf32>
    %c0_12 = arith.constant 0 : index
    %c0_13 = arith.constant 0 : index
    %16 = vector.load %arg6[%c0_12, %c0_13] : memref<32x32xbf16, #tpu.memory_space<vmem>>, vector<32x32xbf16>
    %17 = arith.truncf %15 : vector<32x128xf32> to vector<32x128xbf16>
    %cst_14 = arith.constant dense<0.000000e+00> : vector<32x128xf32>
    %18 = tpu.matmul %16, %17, %cst_14 {dimension_numbers = #tpu.dot_dimension_numbers<[1], [0], [0], [1], [0, 0, 1, 1], [], []>} : vector<32x32xbf16>, vector<32x128xbf16>, vector<32x128xf32> -> vector<32x128xf32>
    %c0_15 = arith.constant 0 : index
    %c0_16 = arith.constant 0 : index
    %19 = vector.load %arg7[%c0_15, %c0_16] : memref<32x1xf32, #tpu.memory_space<vmem>>, vector<32x1xf32>
    %20 = vector.broadcast %19 : vector<32x1xf32> to vector<32x128xf32>
    %21 = arith.addf %18, %20 : vector<32x128xf32>
    %cst_17 = arith.constant 0.000000e+00 : f32
    %22 = vector.broadcast %cst_17 : f32 to vector<32x128xf32>
    %23 = arith.maximumf %21, %22 : vector<32x128xf32>
    %c0_18 = arith.constant 0 : index
    %c0_19 = arith.constant 0 : index
    %24 = vector.load %arg8[%c0_18, %c0_19] : memref<32x32xbf16, #tpu.memory_space<vmem>>, vector<32x32xbf16>
    %25 = arith.truncf %23 : vector<32x128xf32> to vector<32x128xbf16>
    %cst_20 = arith.constant dense<0.000000e+00> : vector<32x128xf32>
    %26 = tpu.matmul %24, %25, %cst_20 {dimension_numbers = #tpu.dot_dimension_numbers<[1], [0], [0], [1], [0, 0, 1, 1], [], []>} : vector<32x32xbf16>, vector<32x128xbf16>, vector<32x128xf32> -> vector<32x128xf32>
    %c0_21 = arith.constant 0 : index
    %c0_22 = arith.constant 0 : index
    %27 = vector.load %arg9[%c0_21, %c0_22] : memref<32x1xf32, #tpu.memory_space<vmem>>, vector<32x1xf32>
    %28 = vector.broadcast %27 : vector<32x1xf32> to vector<32x128xf32>
    %29 = arith.addf %26, %28 : vector<32x128xf32>
    %cst_23 = arith.constant 0.000000e+00 : f32
    %30 = vector.broadcast %cst_23 : f32 to vector<32x128xf32>
    %31 = arith.maximumf %29, %30 : vector<32x128xf32>
    %c0_24 = arith.constant 0 : index
    %c0_25 = arith.constant 0 : index
    %32 = vector.load %arg10[%c0_24, %c0_25] : memref<32x32xbf16, #tpu.memory_space<vmem>>, vector<32x32xbf16>
    %33 = arith.truncf %31 : vector<32x128xf32> to vector<32x128xbf16>
    %cst_26 = arith.constant dense<0.000000e+00> : vector<32x128xf32>
    %34 = tpu.matmul %32, %33, %cst_26 {dimension_numbers = #tpu.dot_dimension_numbers<[1], [0], [0], [1], [0, 0, 1, 1], [], []>} : vector<32x32xbf16>, vector<32x128xbf16>, vector<32x128xf32> -> vector<32x128xf32>
    %c0_27 = arith.constant 0 : index
    %c0_28 = arith.constant 0 : index
    %35 = vector.load %arg11[%c0_27, %c0_28] : memref<32x1xf32, #tpu.memory_space<vmem>>, vector<32x1xf32>
    %36 = vector.broadcast %35 : vector<32x1xf32> to vector<32x128xf32>
    %37 = arith.addf %34, %36 : vector<32x128xf32>
    %cst_29 = arith.constant 0.000000e+00 : f32
    %38 = vector.broadcast %cst_29 : f32 to vector<32x128xf32>
    %39 = arith.maximumf %37, %38 : vector<32x128xf32>
    %c0_30 = arith.constant 0 : index
    %c0_31 = arith.constant 0 : index
    %40 = vector.load %arg12[%c0_30, %c0_31] : memref<32x1xf32, #tpu.memory_space<vmem>>, vector<32x1xf32>
    %41 = vector.broadcast %40 : vector<32x1xf32> to vector<32x128xf32>
    %42 = arith.mulf %39, %41 : vector<32x128xf32>
    %cst_32 = arith.constant dense<0.000000e+00> : vector<128xf32>
    %43 = vector.multi_reduction <add>, %42, %cst_32 [0] : vector<32x128xf32> to vector<128xf32>
    %44 = vector.shape_cast %43 : vector<128xf32> to vector<1x128xf32>
    %c0_33 = arith.constant 0 : index
    %c0_34 = arith.constant 0 : index
    %45 = vector.load %arg13[%c0_33, %c0_34] : memref<1x1xf32, #tpu.memory_space<vmem>>, vector<1x1xf32>
    %46 = vector.broadcast %45 : vector<1x1xf32> to vector<1x128xf32>
    %47 = arith.addf %44, %46 : vector<1x128xf32>
    %48 = arith.negf %47 : vector<1x128xf32>
    %49 = math.exp %48 : vector<1x128xf32>
    %cst_35 = arith.constant 1.000000e+00 : f32
    %50 = vector.broadcast %cst_35 : f32 to vector<1x128xf32>
    %51 = arith.addf %50, %49 : vector<1x128xf32>
    %52 = arith.divf %50, %51 : vector<1x128xf32>
    %c0_36 = arith.constant 0 : index
    %c0_37 = arith.constant 0 : index
    %53 = vector.load %arg14[%c0_36, %c0_37] : memref<1x128xf32, #tpu.memory_space<vmem>>, vector<1x128xf32>
    tpu.vector_store %arg14[%c0_36, %c0_37], %52 {strides = array<i32>} : memref<1x128xf32, #tpu.memory_space<vmem>>, vector<1x128xf32>,
    return
  }
  func.func @transform_0(%arg0: i32) -> (i32, i32) {
    %c0_i32 = arith.constant 0 : i32
    %c0_i32_0 = arith.constant 0 : i32
    return %c0_i32, %arg0 : i32, i32
  }
  func.func @transform_1(%arg0: i32) -> (i32, i32) {
    %c0_i32 = arith.constant 0 : i32
    %c0_i32_0 = arith.constant 0 : i32
    %c0_i32_1 = arith.constant 0 : i32
    return %c0_i32, %c0_i32_0 : i32, i32
  }
  func.func @transform_2(%arg0: i32) -> (i32, i32) {
    %c0_i32 = arith.constant 0 : i32
    %c0_i32_0 = arith.constant 0 : i32
    %c0_i32_1 = arith.constant 0 : i32
    return %c0_i32, %c0_i32_0 : i32, i32
  }
  func.func @transform_3(%arg0: i32) -> (i32, i32) {
    %c0_i32 = arith.constant 0 : i32
    %c0_i32_0 = arith.constant 0 : i32
    %c0_i32_1 = arith.constant 0 : i32
    return %c0_i32, %c0_i32_0 : i32, i32
  }
  func.func @transform_4(%arg0: i32) -> (i32, i32) {
    %c0_i32 = arith.constant 0 : i32
    %c0_i32_0 = arith.constant 0 : i32
    %c0_i32_1 = arith.constant 0 : i32
    return %c0_i32, %c0_i32_0 : i32, i32
  }
  func.func @transform_5(%arg0: i32) -> (i32, i32) {
    %c0_i32 = arith.constant 0 : i32
    %c0_i32_0 = arith.constant 0 : i32
    %c0_i32_1 = arith.constant 0 : i32
    return %c0_i32, %c0_i32_0 : i32, i32
  }
  func.func @transform_6(%arg0: i32) -> (i32, i32) {
    %c0_i32 = arith.constant 0 : i32
    %c0_i32_0 = arith.constant 0 : i32
    %c0_i32_1 = arith.constant 0 : i32
    return %c0_i32, %c0_i32_0 : i32, i32
  }
  func.func @transform_7(%arg0: i32) -> (i32, i32) {
    %c0_i32 = arith.constant 0 : i32
    %c0_i32_0 = arith.constant 0 : i32
    %c0_i32_1 = arith.constant 0 : i32
    return %c0_i32, %c0_i32_0 : i32, i32
  }
  func.func @transform_8(%arg0: i32) -> (i32, i32) {
    %c0_i32 = arith.constant 0 : i32
    %c0_i32_0 = arith.constant 0 : i32
    %c0_i32_1 = arith.constant 0 : i32
    return %c0_i32, %c0_i32_0 : i32, i32
  }
  func.func @transform_9(%arg0: i32) -> (i32, i32) {
    %c0_i32 = arith.constant 0 : i32
    %c0_i32_0 = arith.constant 0 : i32
    %c0_i32_1 = arith.constant 0 : i32
    return %c0_i32, %c0_i32_0 : i32, i32
  }
  func.func @transform_10(%arg0: i32) -> (i32, i32) {
    %c0_i32 = arith.constant 0 : i32
    %c0_i32_0 = arith.constant 0 : i32
    %c0_i32_1 = arith.constant 0 : i32
    return %c0_i32, %c0_i32_0 : i32, i32
  }
  func.func @transform_11(%arg0: i32) -> (i32, i32) {
    %c0_i32 = arith.constant 0 : i32
    %c0_i32_0 = arith.constant 0 : i32
    %c0_i32_1 = arith.constant 0 : i32
    return %c0_i32, %c0_i32_0 : i32, i32
  }
  func.func @transform_12(%arg0: i32) -> (i32, i32) {
    %c0_i32 = arith.constant 0 : i32
    %c0_i32_0 = arith.constant 0 : i32
    %c0_i32_1 = arith.constant 0 : i32
    return %c0_i32, %c0_i32_0 : i32, i32
  }
  func.func @transform_13(%arg0: i32) -> (i32, i32) {
    %c0_i32 = arith.constant 0 : i32
    %c0_i32_0 = arith.constant 0 : i32
    return %c0_i32, %arg0 : i32, i32
  }
}

</mosaic_0001>

<bundles_post_ra>
// kernel: custom_model_forward.1
= control target key start
LH: loop header
LB: loop body
LE: loop exit
PB: predicated region body
PF: predicated region fallthrough
CT: control target
= control target key end

     0   :  { %s1488_s0 = inlined_call_operand.hbm [shape: bf16[4,128], index: 0, kind: input, shape index: {}]   ;;  %s1489_s1 = inlined_call_operand.hbm [shape: bf16[32,4], index: 1, kind: input, shape index: {}]   ;;  %s1490_s2 = inlined_call_operand.hbm [shape: f32[32,1], index: 2, kind: input, shape index: {}]   ;;  %s1491_s3 = inlined_call_operand.hbm [shape: bf16[32,32], index: 3, kind: input, shape index: {}]   ;;  %s1492_s4 = inlined_call_operand.hbm [shape: f32[32,1], index: 4, kind: input, shape index: {}]   ;;  %s1493_s5 = inlined_call_operand.hbm [shape: bf16[32,32], index: 5, kind: input, shape index: {}]   ;;  %s1494_s6 = inlined_call_operand.hbm [shape: f32[32,1], index: 6, kind: input, shape index: {}]   ;;  %s1495_s7 = inlined_call_operand.hbm [shape: bf16[32,32], index: 7, kind: input, shape index: {}]   ;;  %s1496_s8 = inlined_call_operand.hbm [shape: f32[32,1], index: 8, kind: input, shape index: {}]   ;;  %s1497_s9 = inlined_call_operand.hbm [shape: bf16[32,32], index: 9, kind: input, shape index: {}]   ;;  %s1498_s10 = inlined_call_operand.hbm [shape: f32[32,1], index: 10, kind: input, shape index: {}]   ;;  %s1499_s11 = inlined_call_operand.hbm [shape: f32[32,1], index: 11, kind: input, shape index: {}]   ;;  %s1500_s12 = inlined_call_operand.<no memory space> [shape: f32[1,1], index: 12, kind: input, shape index: {}]   ;;  %s1501_s13 = inlined_call_operand.hbm [shape: f32[1,128], index: 13, kind: output, shape index: {}]  }
   0x1   :  { %v18_v0 = vstv %s1500_s12 }
   0x2   :  { %19 = vst [vmem:[#allocation2] sm:$0x1] %v18_v0 }
   0x3   :  { %20 = vsyncpa [#allocation4], 0 }
   0x4   :  { %21 = vsyncpa [#allocation7], 0 }
   0x5   :  { %22 = vsyncpa [#allocation10], 0 }
   0x6   :  { %23 = vsyncpa [#allocation13], 0 }
   0x7   :  { %24 = vsyncpa [#allocation16], 0 }
   0x8   :  { %25 = vsyncpa [#allocation19], 0 }
   0x9   :  { %26 = vsyncpa [#allocation22], 0 }
   0xa   :  { %27 = vsyncpa [#allocation5], 0  ;;  %s1200_s27 = smov [#allocation6]   ;;  %s898_s14 = scalar_lea.hbm %s1489_s1, 256 }
   0xb   :  { %s43_s28 = sshll.u32 %s1200_s27, 4  ;;  %p899_p0 = scmp.ne.s32.totalorder %s1489_s1, %s898_s14  ;;  %s44_s28 = int_to_ptr.vmem [resolvable:$true] %s43_s28 }
   0xc   :  { %p902_p1 = scmp.lt.u32.totalorder %s898_s14, %s1489_s1 }
   0xe   :  { %p904_p2 = pnand %p902_p1, %p899_p0 }
  0x10   :  { %907 = shalt.err (!%p904_p2)
}
  0x11   :  { %s908_s18 = scalar_lea.vmem %s44_s28, 256  ;;  %p913_p4 = scmp.lt.s32.totalorder %s44_s28, %s44_s28 }
  0x12   :  { %p909_p3 = scmp.ne.s32.totalorder %s44_s28, %s908_s18  ;;  %p914_p5 = scmp.lt.s32.totalorder %s908_s18, %s908_s18 }
  0x14   :  { %p915_p6 = por %p914_p5, %p913_p4 }
  0x16   :  { %p916_p7 = pnand %p915_p6, %p909_p3 }
  0x18   :  { %919 = shalt.err (!%p916_p7)
}
  0x19   :  { %s1201_s19 = smov 64   ;;  %s1202_s20 = smov 4  }
  0x1a   :  { %49 = dma.hbm_to_vmem [thread:$0]  %s1489_s1, 256, %s44_s28, [#allocation7], %s1201_s19, %s1201_s19, %s1202_s20  }
  0x1b   :  { %s1203_s23 = smov [#allocation9]   ;;  %s1204_s25 = smov [#allocation12]  }
  0x1c   :  { %s67_s24 = sshll.u32 %s1203_s23, 4  ;;  %s91_s26 = sshll.u32 %s1204_s25, 4  ;;  %s68_s24 = int_to_ptr.vmem [resolvable:$true] %s67_s24  ;;  %s92_s26 = int_to_ptr.vmem [resolvable:$true] %s91_s26 }
  0x1d   :  { %s920_s30 = scalar_lea.hbm %s1491_s3, 256 }
  0x1e   :  { %p921_p8 = scmp.ne.s32.totalorder %s1491_s3, %s920_s30  ;;  %p924_p9 = scmp.lt.u32.totalorder %s920_s30, %s1491_s3 }
  0x20   :  { %p926_p10 = pnand %p924_p9, %p921_p8 }
  0x22   :  { %929 = shalt.err (!%p926_p10)
}
  0x23   :  { %s930_s1 = scalar_lea.vmem %s68_s24, 256  ;;  %p935_p12 = scmp.lt.s32.totalorder %s68_s24, %s68_s24 }
  0x24   :  { %p931_p11 = scmp.ne.s32.totalorder %s68_s24, %s930_s1  ;;  %p936_p13 = scmp.lt.s32.totalorder %s930_s1, %s930_s1 }
  0x26   :  { %p937_p0 = por %p936_p13, %p935_p12 }
  0x28   :  { %p938_p1 = pnand %p937_p0, %p931_p11 }
  0x2a   :  { %941 = shalt.err (!%p938_p1)
}
  0x2b   :  { %73 = dma.hbm_to_vmem [thread:$0]  %s1491_s3, 256, %s68_s24, [#allocation10], %s1201_s19, %s1201_s19, %s1202_s20  }
  0x2c   :  { %s942_s22 = scalar_lea.hbm %s1493_s5, 256 }
  0x2d   :  { %p943_p2 = scmp.ne.s32.totalorder %s1493_s5, %s942_s22  ;;  %p946_p3 = scmp.lt.u32.totalorder %s942_s22, %s1493_s5 }
  0x2f   :  { %p948_p4 = pnand %p946_p3, %p943_p2 }
  0x31   :  { %951 = shalt.err (!%p948_p4)
}
  0x32   :  { %s952_s30 = scalar_lea.vmem %s92_s26, 256  ;;  %p957_p6 = scmp.lt.s32.totalorder %s92_s26, %s92_s26 }
  0x33   :  { %p953_p5 = scmp.ne.s32.totalorder %s92_s26, %s952_s30  ;;  %p958_p7 = scmp.lt.s32.totalorder %s952_s30, %s952_s30 }
  0x35   :  { %p959_p8 = por %p958_p7, %p957_p6 }
  0x37   :  { %p960_p9 = pnand %p959_p8, %p953_p5 }
  0x39   :  { %963 = shalt.err (!%p960_p9)
}
  0x3a   :  { %97 = dma.hbm_to_vmem [thread:$0]  %s1493_s5, 256, %s92_s26, [#allocation13], %s1201_s19, %s1201_s19, %s1202_s20  }
  0x3b   :  { %s1205_s14 = smov [#allocation15]   ;;  %s1206_s16 = smov [#allocation18]  }
  0x3c   :  { %s115_s15 = sshll.u32 %s1205_s14, 4  ;;  %s139_s12 = sshll.u32 %s1206_s16, 4  ;;  %s116_s15 = int_to_ptr.vmem [resolvable:$true] %s115_s15  ;;  %s140_s12 = int_to_ptr.vmem [resolvable:$true] %s139_s12 }
  0x3d   :  { %s964_s17 = scalar_lea.hbm %s1495_s7, 256 }
  0x3e   :  { %p965_p10 = scmp.ne.s32.totalorder %s1495_s7, %s964_s17  ;;  %p968_p11 = scmp.lt.u32.totalorder %s964_s17, %s1495_s7 }
  0x40   :  { %p970_p12 = pnand %p968_p11, %p965_p10 }
  0x42   :  { %973 = shalt.err (!%p970_p12)
}
  0x43   :  { %s974_s5 = scalar_lea.vmem %s116_s15, 256  ;;  %p979_p0 = scmp.lt.s32.totalorder %s116_s15, %s116_s15 }
  0x44   :  { %p975_p13 = scmp.ne.s32.totalorder %s116_s15, %s974_s5  ;;  %p980_p1 = scmp.lt.s32.totalorder %s974_s5, %s974_s5 }
  0x46   :  { %p981_p2 = por %p980_p1, %p979_p0 }
  0x48   :  { %p982_p3 = pnand %p981_p2, %p975_p13 }
  0x4a   :  { %985 = shalt.err (!%p982_p3)
}
  0x4b   :  { %121 = dma.hbm_to_vmem [thread:$0]  %s1495_s7, 256, %s116_s15, [#allocation16], %s1201_s19, %s1201_s19, %s1202_s20  }
  0x4c   :  { %s986_s30 = scalar_lea.hbm %s1497_s9, 256 }
  0x4d   :  { %p987_p4 = scmp.ne.s32.totalorder %s1497_s9, %s986_s30  ;;  %p990_p5 = scmp.lt.u32.totalorder %s986_s30, %s1497_s9 }
  0x4f   :  { %p992_p6 = pnand %p990_p5, %p987_p4 }
  0x51   :  { %995 = shalt.err (!%p992_p6)
}
  0x52   :  { %s996_s1 = scalar_lea.vmem %s140_s12, 256  ;;  %p1001_p8 = scmp.lt.s32.totalorder %s140_s12, %s140_s12 }
  0x53   :  { %p997_p7 = scmp.ne.s32.totalorder %s140_s12, %s996_s1  ;;  %p1002_p9 = scmp.lt.s32.totalorder %s996_s1, %s996_s1 }
  0x55   :  { %p1003_p10 = por %p1002_p9, %p1001_p8 }
  0x57   :  { %p1004_p11 = pnand %p1003_p10, %p997_p7 }
  0x59   :  { %1007 = shalt.err (!%p1004_p11)
}
  0x5a   :  { %145 = dma.hbm_to_vmem [thread:$0]  %s1497_s9, 256, %s140_s12, [#allocation19], %s1201_s19, %s1201_s19, %s1202_s20  }
  0x5b   :  { %s1207_s28 = smov [#allocation3]   ;;  %s1208_s18 = smov [#allocation8]  }
  0x5c   :  { %s34_s17 = sshll.u32 %s1207_s28, 4  ;;  %s55_s21 = sshll.u32 %s1208_s18, 4  ;;  %s35_s17 = int_to_ptr.vmem [resolvable:$true] %s34_s17  ;;  %s56_s21 = int_to_ptr.vmem [resolvable:$true] %s55_s21 }
  0x5d   :  { %s1008_s5 = scalar_lea.hbm %s1488_s0, 32 }
  0x5e   :  { %p1009_p12 = scmp.ne.s32.totalorder %s1488_s0, %s1008_s5  ;;  %p1012_p13 = scmp.lt.u32.totalorder %s1008_s5, %s1488_s0 }
  0x60   :  { %p1014_p0 = pnand %p1012_p13, %p1009_p12 }
  0x62   :  { %1017 = shalt.err (!%p1014_p0)
}
  0x63   :  { %s1018_s9 = scalar_lea.vmem %s35_s17, 32  ;;  %p1023_p2 = scmp.lt.s32.totalorder %s35_s17, %s35_s17 }
  0x64   :  { %p1019_p1 = scmp.ne.s32.totalorder %s35_s17, %s1018_s9  ;;  %p1024_p3 = scmp.lt.s32.totalorder %s1018_s9, %s1018_s9 }
  0x66   :  { %p1025_p4 = por %p1024_p3, %p1023_p2 }
  0x68   :  { %p1026_p5 = pnand %p1025_p4, %p1019_p1 }
  0x6a   :  { %1029 = shalt.err (!%p1026_p5)
}
  0x6b   :  { %37 = dma.hbm_to_vmem [thread:$0]  %s1488_s0, 32, %s35_s17, [#allocation4]  }
  0x6c   :  { %s1030_s3 = scalar_lea.hbm %s1490_s2, 512 }
  0x6d   :  { %p1031_p6 = scmp.ne.s32.totalorder %s1490_s2, %s1030_s3  ;;  %p1034_p7 = scmp.lt.u32.totalorder %s1030_s3, %s1490_s2 }
  0x6f   :  { %p1036_p8 = pnand %p1034_p7, %p1031_p6 }
  0x71   :  { %1039 = shalt.err (!%p1036_p8)
}
  0x72   :  { %s1040_s7 = scalar_lea.vmem %s56_s21, 512  ;;  %p1045_p10 = scmp.lt.s32.totalorder %s56_s21, %s56_s21 }
  0x73   :  { %p1041_p9 = scmp.ne.s32.totalorder %s56_s21, %s1040_s7  ;;  %p1046_p11 = scmp.lt.s32.totalorder %s1040_s7, %s1040_s7 }
  0x75   :  { %p1047_p12 = por %p1046_p11, %p1045_p10 }
  0x77   :  { %p1048_p13 = pnand %p1047_p12, %p1041_p9 }
  0x79   :  { %1051 = shalt.err (!%p1048_p13)
}
  0x7a   :  { %s1209_s0 = smov 128   ;;  %s1210_s15 = smov 8  }
  0x7b   :  { %61 = dma.hbm_to_vmem [thread:$0]  %s1490_s2, 512, %s56_s21, [#allocation7], %s1209_s0, %s1209_s0, %s1210_s15  }
  0x7c   :  { %s1211_s18 = smov [#allocation11]   ;;  %s1212_s23 = smov [#allocation14]  }
  0x7d   :  { %s79_s22 = sshll.u32 %s1211_s18, 4  ;;  %s103_s5 = sshll.u32 %s1212_s23, 4  ;;  %s80_s22 = int_to_ptr.vmem [resolvable:$true] %s79_s22  ;;  %s104_s5 = int_to_ptr.vmem [resolvable:$true] %s103_s5 }
  0x7e   :  { %s1052_s27 = scalar_lea.hbm %s1492_s4, 512 }
  0x7f   :  { %p1053_p0 = scmp.ne.s32.totalorder %s1492_s4, %s1052_s27  ;;  %p1056_p1 = scmp.lt.u32.totalorder %s1052_s27, %s1492_s4 }
  0x81   :  { %p1058_p2 = pnand %p1056_p1, %p1053_p0 }
  0x83   :  { %1061 = shalt.err (!%p1058_p2)
}
  0x84   :  { %s1062_s2 = scalar_lea.vmem %s80_s22, 512  ;;  %p1067_p4 = scmp.lt.s32.totalorder %s80_s22, %s80_s22 }
  0x85   :  { %p1063_p3 = scmp.ne.s32.totalorder %s80_s22, %s1062_s2  ;;  %p1068_p5 = scmp.lt.s32.totalorder %s1062_s2, %s1062_s2 }
  0x87   :  { %p1069_p6 = por %p1068_p5, %p1067_p4 }
  0x89   :  { %p1070_p7 = pnand %p1069_p6, %p1063_p3 }
  0x8b   :  { %1073 = shalt.err (!%p1070_p7)
}
  0x8c   :  { %85 = dma.hbm_to_vmem [thread:$0]  %s1492_s4, 512, %s80_s22, [#allocation10], %s1209_s0, %s1209_s0, %s1210_s15  }
  0x8d   :  { %s1074_s24 = scalar_lea.hbm %s1494_s6, 512 }
  0x8e   :  { %p1075_p8 = scmp.ne.s32.totalorder %s1494_s6, %s1074_s24  ;;  %p1078_p9 = scmp.lt.u32.totalorder %s1074_s24, %s1494_s6 }
  0x90   :  { %p1080_p10 = pnand %p1078_p9, %p1075_p8 }
  0x92   :  { %1083 = shalt.err (!%p1080_p10)
}
  0x93   :  { %s1084_s28 = scalar_lea.vmem %s104_s5, 512  ;;  %p1089_p12 = scmp.lt.s32.totalorder %s104_s5, %s104_s5 }
  0x94   :  { %p1085_p11 = scmp.ne.s32.totalorder %s104_s5, %s1084_s28  ;;  %p1090_p13 = scmp.lt.s32.totalorder %s1084_s28, %s1084_s28 }
  0x96   :  { %p1091_p0 = por %p1090_p13, %p1089_p12 }
  0x98   :  { %p1092_p1 = pnand %p1091_p0, %p1085_p11 }
  0x9a   :  { %1095 = shalt.err (!%p1092_p1)
}
  0x9b   :  { %109 = dma.hbm_to_vmem [thread:$0]  %s1494_s6, 512, %s104_s5, [#allocation13], %s1209_s0, %s1209_s0, %s1210_s15  }
  0x9c   :  { %s1213_s18 = smov [#allocation17]   ;;  %s1214_s23 = smov [#allocation20]  }
  0x9d   :  { %s127_s22 = sshll.u32 %s1213_s18, 4  ;;  %s151_s26 = sshll.u32 %s1214_s23, 4  ;;  %s128_s22 = int_to_ptr.vmem [resolvable:$true] %s127_s22  ;;  %s152_s26 = int_to_ptr.vmem [resolvable:$true] %s151_s26 }
  0x9e   :  { %s1096_s29 = scalar_lea.hbm %s1496_s8, 512 }
  0x9f   :  { %p1097_p2 = scmp.ne.s32.totalorder %s1496_s8, %s1096_s29  ;;  %p1100_p3 = scmp.lt.u32.totalorder %s1096_s29, %s1496_s8 }
  0xa1   :  { %p1102_p4 = pnand %p1100_p3, %p1097_p2 }
  0xa3   :  { %1105 = shalt.err (!%p1102_p4)
}
  0xa4   :  { %s1106_s6 = scalar_lea.vmem %s128_s22, 512  ;;  %p1111_p6 = scmp.lt.s32.totalorder %s128_s22, %s128_s22 }
  0xa5   :  { %p1107_p5 = scmp.ne.s32.totalorder %s128_s22, %s1106_s6  ;;  %p1112_p7 = scmp.lt.s32.totalorder %s1106_s6, %s1106_s6 }
  0xa7   :  { %p1113_p8 = por %p1112_p7, %p1111_p6 }
  0xa9   :  { %p1114_p9 = pnand %p1113_p8, %p1107_p5 }
  0xab   :  { %1117 = shalt.err (!%p1114_p9)
}
  0xac   :  { %133 = dma.hbm_to_vmem [thread:$0]  %s1496_s8, 512, %s128_s22, [#allocation16], %s1209_s0, %s1209_s0, %s1210_s15  }
  0xad   :  { %s1118_s3 = scalar_lea.hbm %s1498_s10, 512 }
  0xae   :  { %p1119_p10 = scmp.ne.s32.totalorder %s1498_s10, %s1118_s3  ;;  %p1122_p11 = scmp.lt.u32.totalorder %s1118_s3, %s1498_s10 }
  0xb0   :  { %p1124_p12 = pnand %p1122_p11, %p1119_p10 }
  0xb2   :  { %1127 = shalt.err (!%p1124_p12)
}
  0xb3   :  { %s1128_s7 = scalar_lea.vmem %s152_s26, 512  ;;  %p1133_p0 = scmp.lt.s32.totalorder %s152_s26, %s152_s26 }
  0xb4   :  { %p1129_p13 = scmp.ne.s32.totalorder %s152_s26, %s1128_s7  ;;  %p1134_p1 = scmp.lt.s32.totalorder %s1128_s7, %s1128_s7 }
  0xb6   :  { %p1135_p2 = por %p1134_p1, %p1133_p0 }
  0xb8   :  { %p1136_p3 = pnand %p1135_p2, %p1129_p13 }
  0xba   :  { %1139 = shalt.err (!%p1136_p3)
}
  0xbb   :  { %157 = dma.hbm_to_vmem [thread:$0]  %s1498_s10, 512, %s152_s26, [#allocation19], %s1209_s0, %s1209_s0, %s1210_s15  }
  0xbc   :  { %s1215_s4 = smov [#allocation21]   ;;  %s1140_s23 = scalar_lea.hbm %s1499_s11, 512 }
  0xbd   :  { %s163_s17 = sshll.u32 %s1215_s4, 4  ;;  %p1141_p4 = scmp.ne.s32.totalorder %s1499_s11, %s1140_s23  ;;  %s164_s17 = int_to_ptr.vmem [resolvable:$true] %s163_s17 }
  0xbe   :  { %p1144_p5 = scmp.lt.u32.totalorder %s1140_s23, %s1499_s11 }
  0xc0   :  { %p1146_p6 = pnand %p1144_p5, %p1141_p4 }
  0xc2   :  { %1149 = shalt.err (!%p1146_p6)
}
  0xc3   :  { %s1150_s19 = scalar_lea.vmem %s164_s17, 512  ;;  %p1155_p8 = scmp.lt.s32.totalorder %s164_s17, %s164_s17 }
  0xc4   :  { %p1151_p7 = scmp.ne.s32.totalorder %s164_s17, %s1150_s19  ;;  %p1156_p9 = scmp.lt.s32.totalorder %s1150_s19, %s1150_s19 }
  0xc6   :  { %p1157_p10 = por %p1156_p9, %p1155_p8 }
  0xc8   :  { %p1158_p11 = pnand %p1157_p10, %p1151_p7 }
  0xca   :  { %1161 = shalt.err (!%p1158_p11)
}
  0xcb   :  { %169 = dma.hbm_to_vmem [thread:$0]  %s1499_s11, 512, %s164_s17, [#allocation22], %s1209_s0, %s1209_s0, %s1210_s15  }
  0xcc   :  { %1184 = dma.done.wait [#allocation4], 32  }
  0xcd   :  { %1185 = vsyncadd [#allocation4], 4294967264 }
  0xce   :  { %1186 = dma.done.wait [#allocation7], 768  }
  0xcf   :  { %1187 = vsyncadd [#allocation7], 4294966528 }
  0xd0   :  { %1188 = dma.done.wait [#allocation10], 768  }
  0xd1   :  { %1189 = vsyncadd [#allocation10], 4294966528 }
  0xd2   :  { %1190 = dma.done.wait [#allocation13], 768  }
  0xd3   :  { %1191 = vsyncadd [#allocation13], 4294966528 }
  0xd4   :  { %1192 = dma.done.wait [#allocation16], 768  }
  0xd5   :  { %1193 = vsyncadd [#allocation16], 4294966528 }
  0xd6   :  { %1194 = dma.done.wait [#allocation19], 768  }
  0xd7   :  { %1195 = vsyncadd [#allocation19], 4294966528 }
  0xd8   :  { %1196 = dma.done.wait [#allocation22], 512  }
  0xd9   :  { %1197 = vsyncadd [#allocation22], 4294966784  ;;  %v1216_v1 = vmov 0   ;;  %vm255_vm0 = vcmask 1041408   ;;  %vm248_vm1 = vcmask 31744   ;;  %v884_v4 = vld [vmem:[#allocation6] sm:$0xff]  }
  0xda   :  { %882 = vset.pattern.permute.xlu0 %v1216_v1  ;;  %883 = vset.pattern.permute.xlu1 %v1216_v1  ;;  %v209_v2 = vld [vmem:[#allocation3] sm:$0x3]  ;;  %v885_v5 = vld [vmem:[#allocation6 + $0x8] sm:$0xff]   ;;  %v214_v6 = vld [vmem:[#allocation8] sm:$0xff]  ;;  %vm352_vm2 = vcmask 261120   ;;  %s1217_s11 = smov [#allocation23]  }
  0xdb   :  { %863 = vmatprep.subr.msk.bf16.mxu0 %vm255_vm0, %v209_v2  ;;  %v257_v3 = vsel %vm255_vm0, %v209_v2, 0  ;;  %827 = vmatprep.mubr.msk.bf16.mxu0 %vm248_vm1, %v884_v4  ;;  %v216_v7 = vld [vmem:[#allocation8 + $0x10] sm:$0xff]  ;;  %v215_v8 = vld [vmem:[#allocation8 + $0x8] sm:$0xff]  ;;  %v217_v9 = vld [vmem:[#allocation8 + $0x18] sm:$0xff]  ;;  %s770_s0 = sshll.u32 %s1217_s11, 4  ;;  %s771_s0 = int_to_ptr.vmem [resolvable:$true] %s770_s0 }
  0xdc   :  { %826 = vmatpush3.bf16.msra.mxu0 %v257_v3  ;;  %220 = vperm.xlu0 %882, %v214_v6   ;;  %v318_v10 = vld [vmem:[#allocation11] sm:$0xff]  ;;  %v319_v11 = vld [vmem:[#allocation11 + $0x8] sm:$0xff]  ;;  %v320_v12 = vld [vmem:[#allocation11 + $0x10] sm:$0xff]  ;;  %s1162_s15 = scalar_lea.vmem %s771_s0, 16  ;;  %s1166_s20 = scalar_lea.vmem %s771_s0, 32 }
  0xdd   :  { %230 = vperm.xlu1 %883, %v216_v7   ;;  %v321_v13 = vld [vmem:[#allocation11 + $0x18] sm:$0xff]  ;;  %v418_v14 = vld [vmem:[#allocation14] sm:$0xff]  ;;  %v420_v16 = vld [vmem:[#allocation14 + $0x10] sm:$0xff]  ;;  %p1163_p12 = scmp.ne.s32.totalorder %s771_s0, %s1162_s15  ;;  %p1167_p13 = scmp.lt.s32.totalorder %s771_s0, %s771_s0 }
  0xde   :  { %v419_v15 = vld [vmem:[#allocation14 + $0x8] sm:$0xff]  ;;  %v421_v17 = vld [vmem:[#allocation14 + $0x18] sm:$0xff]  ;;  %v517_v18 = vld [vmem:[#allocation17] sm:$0xff]  ;;  %p1168_p0 = scmp.lt.s32.totalorder %s1166_s20, %s1162_s15 }
  0xdf   :  { %828 = vmatmul.mubr.msk.bf16.vlgmr.msra.gmra.mrb[0].mxu0 %vm248_vm1, %v885_v5  ;;  %v518_v19 = vld [vmem:[#allocation17 + $0x8] sm:$0xff]  ;;  %v519_v20 = vld [vmem:[#allocation17 + $0x10] sm:$0xff]  ;;  %v520_v21 = vld [vmem:[#allocation17 + $0x18] sm:$0xff] }
  0xe0   :  { %225 = vperm.xlu0 %882, %v215_v8   ;;  %v616_v22 = vld [vmem:[#allocation20] sm:$0xff]  ;;  %v617_v23 = vld [vmem:[#allocation20 + $0x8] sm:$0xff]  ;;  %v618_v24 = vld [vmem:[#allocation20 + $0x10] sm:$0xff]  ;;  %p1169_p1 = por %p1168_p0, %p1167_p13 }
  0xe1   :  { %235 = vperm.xlu1 %883, %v217_v9   ;;  %v619_v25 = vld [vmem:[#allocation20 + $0x18] sm:$0xff]  ;;  %v709_v26 = vld [vmem:[#allocation21] sm:$0xff]  ;;  %v710_v27 = vld [vmem:[#allocation21 + $0x8] sm:$0xff] }
  0xe2   :  { %v711_v28 = vld [vmem:[#allocation21 + $0x10] sm:$0xff]  ;;  %v712_v29 = vld [vmem:[#allocation21 + $0x18] sm:$0xff]  ;;  %v746_v30 = vld [vmem:[#allocation2] sm:$0x1]  ;;  %p1170_p2 = pnand %p1169_p1, %p1163_p12 }
  0xe3   :  { %v886_v31 = vld [vmem:[#allocation9] sm:$0xff]   ;;  %v887_v50 = vld [vmem:[#allocation9 + $0x8] sm:$0xff]   ;;  %v888_v51 = vld [vmem:[#allocation12] sm:$0xff]  }
  0xe4   :  { %324 = vperm.xlu0 %882, %v318_v10   ;;  %835 = vmatprep.mubr.msk.bf16.mxu1 %vm352_vm2, %v886_v31  ;;  %v889_v6 = vld [vmem:[#allocation12 + $0x8] sm:$0xff]   ;;  %v890_v7 = vld [vmem:[#allocation15] sm:$0xff]  }
  0xe5   :  { %329 = vperm.xlu1 %883, %v319_v11   ;;  %843 = vmatprep.mubr.msk.bf16.mxu0 %vm352_vm2, %v888_v51 }
  0xe8   :  { %334 = vperm.xlu0 %882, %v320_v12  }
  0xe9   :  { %339 = vperm.xlu1 %883, %v321_v13  }
  0xec   :  { %424 = vperm.xlu0 %882, %v418_v14  }
  0xed   :  { %429 = vperm.xlu1 %883, %v419_v15  }
  0xf0   :  { %434 = vperm.xlu0 %882, %v420_v16  }
  0xf1   :  { %439 = vperm.xlu1 %883, %v421_v17  }
  0xf4   :  { %523 = vperm.xlu0 %882, %v517_v18  }
  0xf5   :  { %528 = vperm.xlu1 %883, %v518_v19  }
  0xf8   :  { %533 = vperm.xlu0 %882, %v519_v20  }
  0xf9   :  { %538 = vperm.xlu1 %883, %v520_v21  }
  0xfc   :  { %622 = vperm.xlu0 %882, %v616_v22  }
  0xfd   :  { %627 = vperm.xlu1 %883, %v617_v23  }
 0x100   :  { %632 = vperm.xlu0 %882, %v618_v24  }
 0x101   :  { %637 = vperm.xlu1 %883, %v619_v25  }
 0x104   :  { %715 = vperm.xlu0 %882, %v709_v26   ;;  %v891_v26 = vld [vmem:[#allocation15 + $0x8] sm:$0xff]  }
 0x105   :  { %720 = vperm.xlu1 %883, %v710_v27   ;;  %v892_v27 = vld [vmem:[#allocation18] sm:$0xff]  }
 0x108   :  { %725 = vperm.xlu0 %882, %v711_v28  }
 0x109   :  { %730 = vperm.xlu1 %883, %v712_v29  }
 0x10c   :  { %749 = vperm.xlu0 %882, %v746_v30  }
 0x15b   :  { %v221_v33 = vpop.permute.xlu0 %220 }
 0x15c   :  { %v231_v32 = vpop.permute.xlu1 %230 }
 0x15f   :  { %v226_v40 = vpop.permute.xlu0 %225 }
 0x160   :  { %v236_v37 = vpop.permute.xlu1 %235 }
 0x163   :  { %v325_v52 = vpop.permute.xlu0 %324 }
 0x164   :  { %v330_v53 = vpop.permute.xlu1 %329 }
 0x167   :  { %v335_v54 = vpop.permute.xlu0 %334 }
 0x168   :  { %v340_v58 = vpop.permute.xlu1 %339 }
 0x16b   :  { %v425_v8 = vpop.permute.xlu0 %424 }
 0x16c   :  { %v430_v9 = vpop.permute.xlu1 %429 }
 0x16f   :  { %v435_v10 = vpop.permute.xlu0 %434 }
 0x170   :  { %v440_v14 = vpop.permute.xlu1 %439 }
 0x173   :  { %v524_v28 = vpop.permute.xlu0 %523 }
 0x174   :  { %v529_v29 = vpop.permute.xlu1 %528 }
 0x177   :  { %v534_v30 = vpop.permute.xlu0 %533 }
 0x1b2   :  { %v829_v34 = vpop.f32.mrb[0].mxu0 }
 0x1b3   :  { %v302_v35 = vadd.f32 %v829_v34, %v231_v32  ;;  %v293_v36 = vpop.f32.mrb[1].mxu0  ;;  %v539_v34 = vpop.permute.xlu1 %538 }
 0x1b4   :  { %v294_v38 = vadd.f32 %v293_v36, %v221_v33  ;;  %v830_v39 = vpop.f32.mrb[2].mxu0 }
 0x1b5   :  { %v305_v41 = vadd.f32 %v830_v39, %v236_v37  ;;  %v296_v42 = vpop.f32.mrb[3].mxu0  ;;  %v310_v44 = vmax.f32 %v302_v35, 0.0 }
 0x1b6   :  { %v297_v43 = vadd.f32 %v296_v42, %v226_v40  ;;  %v308_v46 = vmax.f32 %v294_v38, 0.0 }
 0x1b7   :  { %v311_v45 = vmax.f32 %v305_v41, 0.0 }
 0x1b8   :  { %v309_v47 = vmax.f32 %v297_v43, 0.0 }
 0x1b9   :  { %v317_v48 = vpack.c.bf16 %v311_v45, %v310_v44 }
 0x1ba   :  { %v316_v49 = vpack.c.bf16 %v309_v47, %v308_v46  ;;  %v893_v46 = vld [vmem:[#allocation18 + $0x8] sm:$0xff]   ;;  %v623_v47 = vpop.permute.xlu0 %622 }
 0x1bc   :  { %831 = vmatprep.subr.bf16.mxu1 %v316_v49 }
 0x1bd   :  { %832 = vmatpush3.bf16.msra.mxu1 %v316_v49 }
 0x1be   :  { %833 = vmatprep.subr.bf16.mxu1 %v317_v48  ;;  %v633_v49 = vpop.permute.xlu0 %632 }
 0x1c1   :  { %834 = vmatpush3.bf16.msra.mxu1 %v317_v48  ;;  %v628_v48 = vpop.permute.xlu1 %627 }
 0x1c4   :  { %836 = vmatmul.mubr.msk.bf16.vlgmr.msra.gmra.mrb[0].mxu1 %vm352_vm2, %v887_v50 }
 0x1c5   :  { %851 = vmatprep.mubr.msk.bf16.mxu1 %vm352_vm2, %v890_v7  ;;  %v638_v50 = vpop.permute.xlu1 %637 }
 0x297   :  { %v837_v55 = vpop.f32.mrb[0].mxu1 }
 0x298   :  { %v402_v56 = vadd.f32 %v837_v55, %v335_v54  ;;  %v393_v57 = vpop.f32.mrb[1].mxu1 }
 0x299   :  { %v394_v59 = vadd.f32 %v393_v57, %v325_v52  ;;  %v838_v60 = vpop.f32.mrb[2].mxu1 }
 0x29a   :  { %v405_v61 = vadd.f32 %v838_v60, %v340_v58  ;;  %v396_v62 = vpop.f32.mrb[3].mxu1  ;;  %v410_v0 = vmax.f32 %v402_v56, 0.0  ;;  %v716_v56 = vpop.permute.xlu0 %715 }
 0x29b   :  { %v397_v63 = vadd.f32 %v396_v62, %v330_v53  ;;  %v408_v2 = vmax.f32 %v394_v59, 0.0 }
 0x29c   :  { %v411_v1 = vmax.f32 %v405_v61, 0.0  ;;  %v721_v61 = vpop.permute.xlu1 %720 }
 0x29d   :  { %v409_v3 = vmax.f32 %v397_v63, 0.0 }
 0x29e   :  { %v417_v4 = vpack.c.bf16 %v411_v1, %v410_v0 }
 0x29f   :  { %v416_v5 = vpack.c.bf16 %v409_v3, %v408_v2  ;;  %v726_v3 = vpop.permute.xlu0 %725 }
 0x2a1   :  { %839 = vmatprep.subr.bf16.mxu0 %v416_v5 }
 0x2a2   :  { %840 = vmatpush3.bf16.msra.mxu0 %v416_v5 }
 0x2a3   :  { %841 = vmatprep.subr.bf16.mxu0 %v417_v4 }
 0x2a6   :  { %842 = vmatpush3.bf16.msra.mxu0 %v417_v4 }
 0x2a9   :  { %844 = vmatmul.mubr.msk.bf16.vlgmr.msra.gmra.mrb[4].mxu0 %vm352_vm2, %v889_v6  ;;  %v731_v6 = vpop.permute.xlu1 %730 }
 0x2aa   :  { %859 = vmatprep.mubr.msk.bf16.mxu0 %vm352_vm2, %v892_v27 }
 0x37c   :  { %v845_v11 = vpop.f32.mrb[4].mxu0 }
 0x37d   :  { %v501_v12 = vadd.f32 %v845_v11, %v435_v10  ;;  %v492_v13 = vpop.f32.mrb[5].mxu0 }
 0x37e   :  { %v493_v15 = vadd.f32 %v492_v13, %v425_v8  ;;  %v846_v16 = vpop.f32.mrb[6].mxu0 }
 0x37f   :  { %v504_v17 = vadd.f32 %v846_v16, %v440_v14  ;;  %v495_v18 = vpop.f32.mrb[7].mxu0  ;;  %v509_v20 = vmax.f32 %v501_v12, 0.0 }
 0x380   :  { %v496_v19 = vadd.f32 %v495_v18, %v430_v9  ;;  %v507_v22 = vmax.f32 %v493_v15, 0.0  ;;  %v752_v9 = vlaneseq }
 0x381   :  { %v510_v21 = vmax.f32 %v504_v17, 0.0  ;;  %v750_v17 = vpop.permute.xlu0 %749 }
 0x382   :  { %v508_v23 = vmax.f32 %v496_v19, 0.0  ;;  %v753_v12 = vshrl.u32 %v752_v9, 7 }
 0x383   :  { %v516_v24 = vpack.c.bf16 %v510_v21, %v509_v20 }
 0x384   :  { %v515_v25 = vpack.c.bf16 %v508_v23, %v507_v22  ;;  %v754_v15 = vsub.s32 0, %v753_v12 }
 0x386   :  { %847 = vmatprep.subr.bf16.mxu1 %v515_v25  ;;  %v755_v19 = vrot.slane %v750_v17, %v754_v15 }
 0x387   :  { %848 = vmatpush3.bf16.msra.mxu1 %v515_v25 }
 0x388   :  { %849 = vmatprep.subr.bf16.mxu1 %v516_v24 }
 0x38b   :  { %850 = vmatpush3.bf16.msra.mxu1 %v516_v24 }
 0x38e   :  { %852 = vmatmul.mubr.msk.bf16.vlgmr.msra.gmra.mrb[4].mxu1 %vm352_vm2, %v891_v26 }
 0x461   :  { %v853_v31 = vpop.f32.mrb[4].mxu1 }
 0x462   :  { %v600_v32 = vadd.f32 %v853_v31, %v534_v30  ;;  %v591_v33 = vpop.f32.mrb[5].mxu1 }
 0x463   :  { %v592_v35 = vadd.f32 %v591_v33, %v524_v28  ;;  %v854_v36 = vpop.f32.mrb[6].mxu1 }
 0x464   :  { %v603_v37 = vadd.f32 %v854_v36, %v539_v34  ;;  %v594_v38 = vpop.f32.mrb[7].mxu1  ;;  %v608_v40 = vmax.f32 %v600_v32, 0.0 }
 0x465   :  { %v595_v39 = vadd.f32 %v594_v38, %v529_v29  ;;  %v606_v42 = vmax.f32 %v592_v35, 0.0 }
 0x466   :  { %v609_v41 = vmax.f32 %v603_v37, 0.0 }
 0x467   :  { %v607_v43 = vmax.f32 %v595_v39, 0.0 }
 0x468   :  { %v615_v44 = vpack.c.bf16 %v609_v41, %v608_v40 }
 0x469   :  { %v614_v45 = vpack.c.bf16 %v607_v43, %v606_v42 }
 0x46b   :  { %855 = vmatprep.subr.bf16.mxu0 %v614_v45 }
 0x46c   :  { %856 = vmatpush3.bf16.msra.mxu0 %v614_v45 }
 0x46d   :  { %857 = vmatprep.subr.bf16.mxu0 %v615_v44 }
 0x470   :  { %858 = vmatpush3.bf16.msra.mxu0 %v615_v44 }
 0x473   :  { %860 = vmatmul.mubr.msk.bf16.vlgmr.msra.gmra.mrb[8].mxu0 %vm352_vm2, %v893_v46 }
 0x546   :  { %v861_v51 = vpop.f32.mrb[8].mxu0 }
 0x547   :  { %v690_v52 = vpop.f32.mrb[9].mxu0  ;;  %v699_v53 = vadd.f32 %v861_v51, %v633_v49 }
 0x548   :  { %v691_v54 = vadd.f32 %v690_v52, %v623_v47  ;;  %v862_v55 = vpop.f32.mrb[10].mxu0 }
 0x549   :  { %v693_v57 = vpop.f32.mrb[11].mxu0  ;;  %v702_v59 = vadd.f32 %v862_v55, %v638_v50  ;;  %v707_v62 = vmax.f32 %v699_v53, 0.0 }
 0x54a   :  { %v705_v58 = vmax.f32 %v691_v54, 0.0  ;;  %v694_v60 = vadd.f32 %v693_v57, %v628_v48 }
 0x54b   :  { %v708_v1 = vmax.f32 %v702_v59, 0.0  ;;  %v735_v4 = vmul.f32 %v726_v3, %v707_v62 }
 0x54c   :  { %v706_v63 = vmax.f32 %v694_v60, 0.0  ;;  %v733_v0 = vmul.f32 %v716_v56, %v705_v58 }
 0x54d   :  { %v736_v7 = vmul.f32 %v731_v6, %v708_v1 }
 0x54e   :  { %v734_v2 = vmul.f32 %v721_v61, %v706_v63 }
 0x550   :  { %v737_v5 = vadd.f32 %v734_v2, %v733_v0 }
 0x552   :  { %v738_v8 = vadd.f32 %v737_v5, %v735_v4 }
 0x554   :  { %v739_v10 = vadd.f32 %v738_v8, %v736_v7 }
 0x556   :  { %v740_v11 = vrot.slane %v739_v10, 4 }
 0x558   :  { %v741_v13 = vadd.f32 %v740_v11, %v739_v10 }
 0x55a   :  { %v742_v14 = vrot.slane %v741_v13, 2 }
 0x55c   :  { %v743_v16 = vadd.f32 %v742_v14, %v741_v13 }
 0x55e   :  { %v744_v18 = vrot.slane %v743_v16, 1 }
 0x560   :  { %v745_v20 = vadd.f32 %v744_v18, %v743_v16 }
 0x562   :  { %v756_v21 = vadd.f32 %v755_v19, %v745_v20 }
 0x564   :  { %v805_v22 = vmul.f32 -1.442695, %v756_v21 }
 0x566   :  { %894 = vpow2.f32 %v805_v22 }
 0x570   :  { %v895_v23 = vpop.eup %894 }
 0x571   :  { %v760_v24 = vadd.f32 1.0, %v895_v23 }
 0x573   :  { %896 = vrcp.f32 %v760_v24 }
 0x57d   :  { %v897_v25 = vpop.eup %896 }
 0x57e   :  { %763 = vst [vmem:[#allocation23] sm:$0x1] %v897_v25 }
 0x57f   :  { %1173 = shalt.err (!%p1170_p2)
}
 0x580   :  { %s1174_s5 = scalar_lea.hbm %s1501_s13, 16 }
 0x581   :  { %p1175_p3 = scmp.ne.s32.totalorder %s1501_s13, %s1174_s5  ;;  %p1178_p4 = scmp.lt.u32.totalorder %s1174_s5, %s1501_s13 }
 0x583   :  { %p1180_p5 = pnand %p1178_p4, %p1175_p3 }
 0x585   :  { %1183 = shalt.err (!%p1180_p5)
}
 0x586   :  { %773 = dma.vmem_to_hbm [thread:$0]  %s771_s0, 16, %s1501_s13, [#allocation5]  }
 0x587   :  { %1198 = dma.done.wait [#allocation5], 16  }
 0x588   :  { %1199 = vsyncadd [#allocation5], 4294967280 }
 0x589   :  { %777 = vsyncpa [#allocation4], 1 }
 0x58a   :  { %778 = vsyncpa [#allocation7], 1 }
 0x58b   :  { %779 = vsyncpa [#allocation10], 1 }
 0x58c   :  { %780 = vsyncpa [#allocation13], 1 }
 0x58d   :  { %781 = vsyncpa [#allocation16], 1 }
 0x58e   :  { %782 = vsyncpa [#allocation19], 1 }
 0x58f   :  { %783 = vsyncpa [#allocation22], 1 }
 0x590   :  { %784 = vsyncpa [#allocation5], 1 }

</bundles_post_ra>
